<compile_context>
chip_gen: v5e
topology: v5e:2x2
jax: 0.10.0
libtpu: 0.0.40
codegen_flags: <defaults>
</compile_context>

<pallas_src>
import functools

import jax
import jax.numpy as jnp
from jax.experimental import pallas as pl
from jax.experimental.pallas import tpu as pltpu


def _round_up(x, m):
    return (x + m - 1) // m * m


_NEG_FLOOR = -1e30  # finite floor for the running max: exp(-inf - floor) == 0, never NaN


def _supcon_kernel(feat_k_ref, feat_qT_ref, lab_q_ref, lab_k_ref,
                   psum_ref, logz_ref, m_scr, d_scr,
                   *, inv_temperature, n_valid, blk, pad):
    qi = pl.program_id(0)
    ki = pl.program_id(1)
    last_k = pl.num_programs(1) - 1

    @pl.when(ki == 0)
    def _init():
        m_scr[...] = jnp.full_like(m_scr, -jnp.inf)
        d_scr[...] = jnp.zeros_like(d_scr)
        psum_ref[...] = jnp.zeros_like(psum_ref)

    # s[k, q] = <f_k, f_q> / T. MXU-natural [blk_k, D] x [D, blk_q]: bf16
    # operands, f32 accumulation; the [k, q] orientation keeps anchors on the
    # lane axis so every per-anchor reduction is a sublane reduction yielding
    # lane-dense [1, blk] stats.
    s = jax.lax.dot_general(
        feat_k_ref[...], feat_qT_ref[...],
        dimension_numbers=(((1,), (0,)), ((), ())),
        preferred_element_type=jnp.float32,
    ) * jnp.float32(inv_temperature)                             # [blk_k, blk_q]

    lab_eq = lab_k_ref[...] == lab_q_ref[...]                    # [blk, blk]

    def accumulate(s_masked, pos_mask):
        # Online log-sum-exp over the contrast axis (running max + rescale).
        tile_max = jnp.max(s_masked, axis=0, keepdims=True)      # [1, blk]
        m_new = jnp.maximum(m_scr[...], tile_max)
        m_safe = jnp.maximum(m_new, jnp.float32(_NEG_FLOOR))     # NaN guard
        alpha = jnp.exp(m_scr[...] - m_safe)
        p = jnp.exp(s_masked - m_safe)                           # masked -> exp(-inf)=0
        d_scr[...] = alpha * d_scr[...] + jnp.sum(p, axis=0, keepdims=True)
        m_scr[...] = m_safe
        # Fused positive pass: only the raw-logit sum over positives is needed
        # (the positive count is applied in the wrapper).
        psum_ref[...] += jnp.sum(jnp.where(pos_mask, s, 0.0), axis=0, keepdims=True)

    # Mask construction is only needed on diagonal tiles (self-contrast) and,
    # when the contrast axis is padded, on the last contrast tile.
    needs_mask = qi == ki
    if pad > 0:
        needs_mask = jnp.logical_or(needs_mask, ki == last_k)

    @pl.when(needs_mask)
    def _masked_tile():
        k_ids = jax.lax.broadcasted_iota(jnp.int32, (blk, 1), 0) + ki * blk
        q_ids = jax.lax.broadcasted_iota(jnp.int32, (1, blk), 1) + qi * blk
        lm = k_ids != q_ids                                      # drop self-contrast
        if pad > 0:                                              # static: drop padded rows
            lm = jnp.logical_and(lm, k_ids < n_valid)
        accumulate(jnp.where(lm, s, -jnp.inf), jnp.logical_and(lab_eq, lm))

    @pl.when(jnp.logical_not(needs_mask))
    def _plain_tile():
        accumulate(s, lab_eq)

    @pl.when(ki == last_k)
    def _finalize():
        logz_ref[...] = m_scr[...] + jnp.log(d_scr[...])


def supcon_loss(features, labels=None, mask=None,
                temperature=0.07, contrast_mode="all", base_temperature=0.07):
    """JAX/Pallas port of SupConLoss.forward (contrast_mode='all')."""
    features = jnp.asarray(features)
    if features.ndim < 3:
        raise ValueError("`features` needs to be [bsz, n_views, ...], "
                         "at least 3 dimensions are required")
    if features.ndim > 3:
        features = features.reshape(features.shape[0], features.shape[1], -1)
    if contrast_mode != "all":
        # TODO(synk): contrast_mode='one' (anchor = first view only) not implemented.
        raise ValueError("only contrast_mode='all' is implemented")

    bsz, n_views, dim = features.shape

    if labels is not None and mask is not None:
        raise ValueError("Cannot define both `labels` and `mask`")
    if mask is not None:
        # TODO(synk): arbitrary [bsz, bsz] mask not supported by the label-based
        # in-kernel mask construction (it would require streaming an N^2 mask).
        raise NotImplementedError("explicit `mask` is not supported; pass `labels`")
    if labels is None:
        # eye(bsz) mask == "same batch index" -> synthesize unique labels.
        labels = jnp.arange(bsz, dtype=jnp.int32)
    labels = jnp.asarray(labels).reshape(-1).astype(jnp.int32)
    if labels.shape[0] != bsz:
        raise ValueError("Num of labels does not match num of features")

    n_total = bsz * n_views

    # contrast_feature = cat(unbind(features, dim=1), dim=0): row = view*bsz + b.
    cf = jnp.transpose(features, (1, 0, 2)).reshape(n_total, dim)

    # Positive count per anchor is label-only: cnt_i = n_views * (#same-label) - 1.
    # Computed here instead of being re-derived from an [N, N] mask in-kernel.
    batch_cnt = jnp.sum(labels[None, :] == labels[:, None], axis=1)
    pos_cnt = jnp.tile(n_views * batch_cnt - 1, (n_views,)).astype(jnp.float32)

    lab_full = jnp.tile(labels, (n_views,))                      # [n_total]

    # Tile size: 512 for large N (quarters per-step pipeline overhead and the
    # O(N^2*D/blk) contrast re-streaming vs 256); 256 for mid sizes so the
    # anchor axis still has >=2 blocks (v7x megacore); a single 128-multiple
    # tile for tiny inputs.
    blk = 512
    if n_total < 2 * blk:
        blk = 256
    if n_total <= blk:
        blk = max(128, _round_up(n_total, 128))
    n_pad = _round_up(n_total, blk)
    pad = n_pad - n_total
    n_blocks = n_pad // blk

    # Zero-pad D to a multiple of 128 so the MXU contraction dim is full
    # (harmless for the dot: padded columns are zero).
    dim_pad = _round_up(dim, 128)

    # bf16 feature operands (native MXU path on every generation, half the DMA
    # traffic of the repeatedly-streamed contrast blocks); accumulation stays
    # f32 via preferred_element_type in the kernel.
    cf_p = jnp.zeros((n_pad, dim_pad), jnp.bfloat16).at[:n_total, :dim].set(
        cf.astype(jnp.bfloat16))
    cf_t = cf_p.T  # one-time XLA transpose -> MXU-natural [D, N] anchor operand

    lab_p = jnp.pad(lab_full, (0, pad), constant_values=-1)
    lab_row = lab_p.reshape(1, n_pad)        # anchors on the lane axis
    lab_col = lab_p.reshape(n_pad, 1)        # contrast rows on the sublane axis

    # Explicit VMEM budget: double-buffered bf16 feature operands + generous
    # headroom for the [blk, blk] f32 elementwise temporaries; never below the
    # scoped default, never above v7x's 64 MiB physical (minus headroom).
    feat_bytes = 2 * 2 * blk * dim_pad * 2
    tmp_bytes = 10 * blk * blk * 4
    vmem_limit = int(min(max(feat_bytes + tmp_bytes + (4 << 20), 32 << 20), 56 << 20))

    kernel = functools.partial(
        _supcon_kernel,
        inv_temperature=1.0 / float(temperature),
        n_valid=n_total,
        blk=blk,
        pad=pad,
    )

    psum, logz = pl.pallas_call(
        kernel,
        out_shape=(jax.ShapeDtypeStruct((1, n_pad), jnp.float32),
                   jax.ShapeDtypeStruct((1, n_pad), jnp.float32)),
        grid_spec=pltpu.PrefetchScalarGridSpec(
            num_scalar_prefetch=0,
            grid=(n_blocks, n_blocks),                 # (anchor, contrast/reduction)
            in_specs=[
                # Contrast features, natural [blk, D] layout (re-streamed each
                # inner step). TODO(synk): set pipeline_mode=pl.Buffered(3) here
                # if profiling shows exposed DMA in the small-D regime.
                pl.BlockSpec((blk, dim_pad), lambda qi, ki: (ki, 0)),
                # Anchor features, pre-transposed [D, blk] (fetched once per qi).
                pl.BlockSpec((dim_pad, blk), lambda qi, ki: (0, qi)),
                pl.BlockSpec((1, blk), lambda qi, ki: (0, qi)),     # anchor labels
                pl.BlockSpec((blk, 1), lambda qi, ki: (ki, 0)),     # contrast labels
            ],
            out_specs=[
                pl.BlockSpec((1, blk), lambda qi, ki: (0, qi)),     # sum(mask*logits)
                pl.BlockSpec((1, blk), lambda qi, ki: (0, qi)),     # logZ
            ],
            scratch_shapes=[pltpu.VMEM((1, blk), jnp.float32)] * 2,  # running max, denom
        ),
        compiler_params=pltpu.CompilerParams(
            dimension_semantics=("parallel", "arbitrary"),
            vmem_limit_bytes=vmem_limit),
    )(cf_p, cf_t, lab_row, lab_col)

    psum = psum[0, :n_total]
    logz = logz[0, :n_total]
    # sum(mask*log_prob) = sum(mask*logits) - cnt*logZ.
    # Note: anchors with zero positives give 0/0 -> NaN, matching the PyTorch
    # reference (which also produces NaN there).
    mean_log_prob_pos = psum / pos_cnt - logz
    loss = -(temperature / base_temperature) * mean_log_prob_pos
    return jnp.mean(loss)


def _supcon_loss_ref(features, labels, temperature=0.07, base_temperature=0.07):
    """Pure-JAX reference (mirrors the PyTorch code) for correctness check."""
    bsz, n_views, dim = features.shape
    labels = labels.reshape(-1, 1)
    mask = (labels == labels.T).astype(jnp.float32)
    cf = jnp.transpose(features, (1, 0, 2)).reshape(n_views * bsz, dim).astype(jnp.float32)
    logits = (cf @ cf.T) / temperature
    logits = logits - jnp.max(logits, axis=1, keepdims=True)
    mask = jnp.tile(mask, (n_views, n_views))
    n = n_views * bsz
    logits_mask = 1.0 - jnp.eye(n, dtype=jnp.float32)
    mask = mask * logits_mask
    exp_logits = jnp.exp(logits) * logits_mask
    log_prob = logits - jnp.log(exp_logits.sum(1, keepdims=True))
    mean_log_prob_pos = (mask * log_prob).sum(1) / mask.sum(1)
    loss = -(temperature / base_temperature) * mean_log_prob_pos
    return loss.reshape(n_views, bsz).mean()


if __name__ == "__main__":
    def make_inputs(key, bsz, n_views, dim, n_classes):
        kf, kl = jax.random.split(key)
        feats = jax.random.normal(kf, (bsz, n_views, dim), dtype=jnp.float32)
        feats = feats / jnp.linalg.norm(feats, axis=-1, keepdims=True)
        # Snap to bf16-representable values so the kernel's bf16 MXU operands
        # match the f32 reference exactly (f32 accumulation on both sides).
        feats = feats.astype(jnp.bfloat16).astype(jnp.float32)
        labels = jax.random.randint(kl, (bsz,), 0, n_classes, dtype=jnp.int32)
        return feats, labels

    k0, k1 = jax.random.split(jax.random.PRNGKey(0))

    # Small single-tile case.
    f0, l0 = make_inputs(k0, bsz=8, n_views=2, dim=32, n_classes=4)
    loss0 = jax.block_until_ready(supcon_loss(f0, labels=l0))
    ref0 = _supcon_loss_ref(f0, l0)
    assert jnp.allclose(loss0, ref0, rtol=1e-4, atol=1e-4), (loss0, ref0)

    # Multi-tile case (exercises tiling, the masked last/diagonal tiles, the
    # unmasked interior fast path and the online log-sum-exp).
    f1, l1 = make_inputs(k1, bsz=160, n_views=2, dim=32, n_classes=4)
    loss1 = jax.block_until_ready(supcon_loss(f1, labels=l1))
    ref1 = _supcon_loss_ref(f1, l1)
    assert jnp.allclose(loss1, ref1, rtol=1e-4, atol=1e-4), (loss1, ref1)

    print("KERNEL_OK")
</pallas_src>

<mosaic_0001>
module attributes {stable_mosaic.version = 11 : i64} {
  func.func @_supcon_kernel(%arg0: i32, %arg1: i32, %arg2: memref<128x128xbf16, #tpu.memory_space<vmem>>, %arg3: memref<128x128xbf16, #tpu.memory_space<vmem>>, %arg4: memref<1x128xi32, #tpu.memory_space<vmem>>, %arg5: memref<128x1xi32, #tpu.memory_space<vmem>>, %arg6: memref<1x128xf32, #tpu.memory_space<vmem>>, %arg7: memref<1x128xf32, #tpu.memory_space<vmem>>, %arg8: memref<1x128xf32, #tpu.memory_space<vmem>>, %arg9: memref<1x128xf32, #tpu.memory_space<vmem>>) attributes {dimension_semantics = [#tpu.dimension_semantics<parallel>, #tpu.dimension_semantics<arbitrary>], iteration_bounds = array<i64: 1, 1>, scalar_prefetch = 0 : i64, scratch_operands = 2 : i64, tpu.core_type = #tpu.core_type<tc>, window_params = [{transform_indices = @transform_0, window_bounds = array<i64: 128, 128>}, {transform_indices = @transform_1, window_bounds = array<i64: 128, 128>}, {transform_indices = @transform_2, window_bounds = array<i64: 1, 128>}, {transform_indices = @transform_3, window_bounds = array<i64: 128, 1>}, {transform_indices = @transform_4, window_bounds = array<i64: 1, 128>}, {transform_indices = @transform_5, window_bounds = array<i64: 1, 128>}]} {
    %c0_i32 = arith.constant 0 : i32
    %0 = arith.cmpi eq, %arg1, %c0_i32 : i32
    %1 = arith.extui %0 : i1 to i32
    %c0_i32_0 = arith.constant 0 : i32
    %2 = arith.cmpi ne, %1, %c0_i32_0 : i32
    scf.if %2 {
      %cst_14 = arith.constant 0xFF800000 : f32
      %24 = vector.broadcast %cst_14 : f32 to vector<1x128xf32>
      %c0_15 = arith.constant 0 : index
      %c0_16 = arith.constant 0 : index
      %25 = vector.load %arg8[%c0_15, %c0_16] : memref<1x128xf32, #tpu.memory_space<vmem>>, vector<1x128xf32>
      tpu.vector_store %arg8[%c0_15, %c0_16], %24 {strides = array<i32>} : memref<1x128xf32, #tpu.memory_space<vmem>>, vector<1x128xf32>,
      %cst_17 = arith.constant 0.000000e+00 : f32
      %26 = vector.broadcast %cst_17 : f32 to vector<1x128xf32>
      %c0_18 = arith.constant 0 : index
      %c0_19 = arith.constant 0 : index
      %27 = vector.load %arg9[%c0_18, %c0_19] : memref<1x128xf32, #tpu.memory_space<vmem>>, vector<1x128xf32>
      tpu.vector_store %arg9[%c0_18, %c0_19], %26 {strides = array<i32>} : memref<1x128xf32, #tpu.memory_space<vmem>>, vector<1x128xf32>,
      %cst_20 = arith.constant 0.000000e+00 : f32
      %28 = vector.broadcast %cst_20 : f32 to vector<1x128xf32>
      %c0_21 = arith.constant 0 : index
      %c0_22 = arith.constant 0 : index
      %29 = vector.load %arg6[%c0_21, %c0_22] : memref<1x128xf32, #tpu.memory_space<vmem>>, vector<1x128xf32>
      tpu.vector_store %arg6[%c0_21, %c0_22], %28 {strides = array<i32>} : memref<1x128xf32, #tpu.memory_space<vmem>>, vector<1x128xf32>,
    } else {
    }
    %c0 = arith.constant 0 : index
    %c0_1 = arith.constant 0 : index
    %3 = vector.load %arg2[%c0, %c0_1] : memref<128x128xbf16, #tpu.memory_space<vmem>>, vector<128x128xbf16>
    %c0_2 = arith.constant 0 : index
    %c0_3 = arith.constant 0 : index
    %4 = vector.load %arg3[%c0_2, %c0_3] : memref<128x128xbf16, #tpu.memory_space<vmem>>, vector<128x128xbf16>
    %cst = arith.constant dense<0.000000e+00> : vector<128x128xf32>
    %5 = tpu.matmul %3, %4, %cst {dimension_numbers = #tpu.dot_dimension_numbers<[1], [0], [0], [1], [0, 0, 1, 1], [], []>} : vector<128x128xbf16>, vector<128x128xbf16>, vector<128x128xf32> -> vector<128x128xf32>
    %cst_4 = arith.constant 14.2857141 : f32
    %6 = vector.broadcast %cst_4 : f32 to vector<128x128xf32>
    %7 = arith.mulf %5, %6 : vector<128x128xf32>
    %c0_5 = arith.constant 0 : index
    %c0_6 = arith.constant 0 : index
    %8 = vector.load %arg5[%c0_5, %c0_6] : memref<128x1xi32, #tpu.memory_space<vmem>>, vector<128x1xi32>
    %c0_7 = arith.constant 0 : index
    %c0_8 = arith.constant 0 : index
    %9 = vector.load %arg4[%c0_7, %c0_8] : memref<1x128xi32, #tpu.memory_space<vmem>>, vector<1x128xi32>
    %10 = vector.broadcast %8 : vector<128x1xi32> to vector<128x128xi32>
    %11 = vector.broadcast %9 : vector<1x128xi32> to vector<128x128xi32>
    %12 = arith.cmpi eq, %10, %11 : vector<128x128xi32>
    %13 = arith.cmpi eq, %arg0, %arg1 : i32
    %c0_i32_9 = arith.constant 0 : i32
    %14 = arith.cmpi eq, %arg1, %c0_i32_9 : i32
    %15 = arith.ori %13, %14 : i1
    %16 = arith.extui %15 : i1 to i32
    %c0_i32_10 = arith.constant 0 : i32
    %17 = arith.cmpi ne, %16, %c0_i32_10 : i32
    scf.if %17 {
      %24 = tpu.iota {dimensions = array<i32: 0>} : vector<128x1xi32>
      %c128_i32 = arith.constant 128 : i32
      %25 = arith.muli %arg1, %c128_i32 : i32
      %26 = vector.broadcast %25 : i32 to vector<128x1xi32>
      %27 = arith.addi %24, %26 : vector<128x1xi32>
      %28 = tpu.iota {dimensions = array<i32: 1>} : vector<1x128xi32>
      %c128_i32_14 = arith.constant 128 : i32
      %29 = arith.muli %arg0, %c128_i32_14 : i32
      %30 = vector.broadcast %29 : i32 to vector<1x128xi32>
      %31 = arith.addi %28, %30 : vector<1x128xi32>
      %32 = vector.broadcast %27 : vector<128x1xi32> to vector<128x128xi32>
      %33 = vector.broadcast %31 : vector<1x128xi32> to vector<128x128xi32>
      %34 = arith.cmpi ne, %32, %33 : vector<128x128xi32>
      %c16_i32 = arith.constant 16 : i32
      %35 = vector.broadcast %c16_i32 : i32 to vector<128x1xi32>
      %36 = arith.cmpi slt, %27, %35 : vector<128x1xi32>
      %37 = vector.broadcast %36 : vector<128x1xi1> to vector<128x128xi1>
      %38 = arith.andi %34, %37 : vector<128x128xi1>
      %cst_15 = arith.constant 0xFF800000 : f32
      %39 = vector.broadcast %cst_15 : f32 to vector<128x128xf32>
      %40 = arith.select %38, %7, %39 : vector<128x128xi1>, vector<128x128xf32>
      %41 = arith.andi %12, %38 : vector<128x128xi1>
      %cst_16 = arith.constant dense<0xFF800000> : vector<128xf32>
      %42 = vector.multi_reduction <maximumf>, %40, %cst_16 [0] : vector<128x128xf32> to vector<128xf32>
      %43 = vector.shape_cast %42 : vector<128xf32> to vector<1x128xf32>
      %c0_17 = arith.constant 0 : index
      %c0_18 = arith.constant 0 : index
      %44 = vector.load %arg8[%c0_17, %c0_18] : memref<1x128xf32, #tpu.memory_space<vmem>>, vector<1x128xf32>
      %45 = arith.maximumf %44, %43 : vector<1x128xf32>
      %cst_19 = arith.constant -1.000000e+30 : f32
      %46 = vector.broadcast %cst_19 : f32 to vector<1x128xf32>
      %47 = arith.maximumf %45, %46 : vector<1x128xf32>
      %c0_20 = arith.constant 0 : index
      %c0_21 = arith.constant 0 : index
      %48 = vector.load %arg8[%c0_20, %c0_21] : memref<1x128xf32, #tpu.memory_space<vmem>>, vector<1x128xf32>
      %49 = arith.subf %48, %47 : vector<1x128xf32>
      %50 = math.exp %49 : vector<1x128xf32>
      %51 = vector.broadcast %47 : vector<1x128xf32> to vector<128x128xf32>
      %52 = arith.subf %40, %51 : vector<128x128xf32>
      %53 = math.exp %52 : vector<128x128xf32>
      %c0_22 = arith.constant 0 : index
      %c0_23 = arith.constant 0 : index
      %54 = vector.load %arg9[%c0_22, %c0_23] : memref<1x128xf32, #tpu.memory_space<vmem>>, vector<1x128xf32>
      %55 = arith.mulf %50, %54 : vector<1x128xf32>
      %cst_24 = arith.constant dense<0.000000e+00> : vector<128xf32>
      %56 = vector.multi_reduction <add>, %53, %cst_24 [0] : vector<128x128xf32> to vector<128xf32>
      %57 = vector.shape_cast %56 : vector<128xf32> to vector<1x128xf32>
      %58 = arith.addf %55, %57 : vector<1x128xf32>
      %c0_25 = arith.constant 0 : index
      %c0_26 = arith.constant 0 : index
      %59 = vector.load %arg9[%c0_25, %c0_26] : memref<1x128xf32, #tpu.memory_space<vmem>>, vector<1x128xf32>
      tpu.vector_store %arg9[%c0_25, %c0_26], %58 {strides = array<i32>} : memref<1x128xf32, #tpu.memory_space<vmem>>, vector<1x128xf32>,
      %c0_27 = arith.constant 0 : index
      %c0_28 = arith.constant 0 : index
      %60 = vector.load %arg8[%c0_27, %c0_28] : memref<1x128xf32, #tpu.memory_space<vmem>>, vector<1x128xf32>
      tpu.vector_store %arg8[%c0_27, %c0_28], %47 {strides = array<i32>} : memref<1x128xf32, #tpu.memory_space<vmem>>, vector<1x128xf32>,
      %c0_29 = arith.constant 0 : index
      %c0_30 = arith.constant 0 : index
      %61 = vector.load %arg6[%c0_29, %c0_30] : memref<1x128xf32, #tpu.memory_space<vmem>>, vector<1x128xf32>
      %cst_31 = arith.constant 0.000000e+00 : f32
      %62 = vector.broadcast %cst_31 : f32 to vector<128x128xf32>
      %63 = arith.select %41, %7, %62 : vector<128x128xi1>, vector<128x128xf32>
      %cst_32 = arith.constant dense<0.000000e+00> : vector<128xf32>
      %64 = vector.multi_reduction <add>, %63, %cst_32 [0] : vector<128x128xf32> to vector<128xf32>
      %65 = vector.shape_cast %64 : vector<128xf32> to vector<1x128xf32>
      %66 = arith.addf %61, %65 : vector<1x128xf32>
      %c0_33 = arith.constant 0 : index
      %c0_34 = arith.constant 0 : index
      %67 = vector.load %arg6[%c0_33, %c0_34] : memref<1x128xf32, #tpu.memory_space<vmem>>, vector<1x128xf32>
      tpu.vector_store %arg6[%c0_33, %c0_34], %66 {strides = array<i32>} : memref<1x128xf32, #tpu.memory_space<vmem>>, vector<1x128xf32>,
    } else {
    }
    %true = arith.constant true
    %18 = arith.xori %15, %true : i1
    %19 = arith.extui %18 : i1 to i32
    %c0_i32_11 = arith.constant 0 : i32
    %20 = arith.cmpi ne, %19, %c0_i32_11 : i32
    scf.if %20 {
      %cst_14 = arith.constant dense<0xFF800000> : vector<128xf32>
      %24 = vector.multi_reduction <maximumf>, %7, %cst_14 [0] : vector<128x128xf32> to vector<128xf32>
      %25 = vector.shape_cast %24 : vector<128xf32> to vector<1x128xf32>
      %c0_15 = arith.constant 0 : index
      %c0_16 = arith.constant 0 : index
      %26 = vector.load %arg8[%c0_15, %c0_16] : memref<1x128xf32, #tpu.memory_space<vmem>>, vector<1x128xf32>
      %27 = arith.maximumf %26, %25 : vector<1x128xf32>
      %cst_17 = arith.constant -1.000000e+30 : f32
      %28 = vector.broadcast %cst_17 : f32 to vector<1x128xf32>
      %29 = arith.maximumf %27, %28 : vector<1x128xf32>
      %c0_18 = arith.constant 0 : index
      %c0_19 = arith.constant 0 : index
      %30 = vector.load %arg8[%c0_18, %c0_19] : memref<1x128xf32, #tpu.memory_space<vmem>>, vector<1x128xf32>
      %31 = arith.subf %30, %29 : vector<1x128xf32>
      %32 = math.exp %31 : vector<1x128xf32>
      %33 = vector.broadcast %29 : vector<1x128xf32> to vector<128x128xf32>
      %34 = arith.subf %7, %33 : vector<128x128xf32>
      %35 = math.exp %34 : vector<128x128xf32>
      %c0_20 = arith.constant 0 : index
      %c0_21 = arith.constant 0 : index
      %36 = vector.load %arg9[%c0_20, %c0_21] : memref<1x128xf32, #tpu.memory_space<vmem>>, vector<1x128xf32>
      %37 = arith.mulf %32, %36 : vector<1x128xf32>
      %cst_22 = arith.constant dense<0.000000e+00> : vector<128xf32>
      %38 = vector.multi_reduction <add>, %35, %cst_22 [0] : vector<128x128xf32> to vector<128xf32>
      %39 = vector.shape_cast %38 : vector<128xf32> to vector<1x128xf32>
      %40 = arith.addf %37, %39 : vector<1x128xf32>
      %c0_23 = arith.constant 0 : index
      %c0_24 = arith.constant 0 : index
      %41 = vector.load %arg9[%c0_23, %c0_24] : memref<1x128xf32, #tpu.memory_space<vmem>>, vector<1x128xf32>
      tpu.vector_store %arg9[%c0_23, %c0_24], %40 {strides = array<i32>} : memref<1x128xf32, #tpu.memory_space<vmem>>, vector<1x128xf32>,
      %c0_25 = arith.constant 0 : index
      %c0_26 = arith.constant 0 : index
      %42 = vector.load %arg8[%c0_25, %c0_26] : memref<1x128xf32, #tpu.memory_space<vmem>>, vector<1x128xf32>
      tpu.vector_store %arg8[%c0_25, %c0_26], %29 {strides = array<i32>} : memref<1x128xf32, #tpu.memory_space<vmem>>, vector<1x128xf32>,
      %c0_27 = arith.constant 0 : index
      %c0_28 = arith.constant 0 : index
      %43 = vector.load %arg6[%c0_27, %c0_28] : memref<1x128xf32, #tpu.memory_space<vmem>>, vector<1x128xf32>
      %cst_29 = arith.constant 0.000000e+00 : f32
      %44 = vector.broadcast %cst_29 : f32 to vector<128x128xf32>
      %45 = arith.select %12, %7, %44 : vector<128x128xi1>, vector<128x128xf32>
      %cst_30 = arith.constant dense<0.000000e+00> : vector<128xf32>
      %46 = vector.multi_reduction <add>, %45, %cst_30 [0] : vector<128x128xf32> to vector<128xf32>
      %47 = vector.shape_cast %46 : vector<128xf32> to vector<1x128xf32>
      %48 = arith.addf %43, %47 : vector<1x128xf32>
      %c0_31 = arith.constant 0 : index
      %c0_32 = arith.constant 0 : index
      %49 = vector.load %arg6[%c0_31, %c0_32] : memref<1x128xf32, #tpu.memory_space<vmem>>, vector<1x128xf32>
      tpu.vector_store %arg6[%c0_31, %c0_32], %48 {strides = array<i32>} : memref<1x128xf32, #tpu.memory_space<vmem>>, vector<1x128xf32>,
    } else {
    }
    %c0_i32_12 = arith.constant 0 : i32
    %21 = arith.cmpi eq, %arg1, %c0_i32_12 : i32
    %22 = arith.extui %21 : i1 to i32
    %c0_i32_13 = arith.constant 0 : i32
    %23 = arith.cmpi ne, %22, %c0_i32_13 : i32
    scf.if %23 {
      %c0_14 = arith.constant 0 : index
      %c0_15 = arith.constant 0 : index
      %24 = vector.load %arg8[%c0_14, %c0_15] : memref<1x128xf32, #tpu.memory_space<vmem>>, vector<1x128xf32>
      %c0_16 = arith.constant 0 : index
      %c0_17 = arith.constant 0 : index
      %25 = vector.load %arg9[%c0_16, %c0_17] : memref<1x128xf32, #tpu.memory_space<vmem>>, vector<1x128xf32>
      %26 = math.log %25 : vector<1x128xf32>
      %27 = arith.addf %24, %26 : vector<1x128xf32>
      %c0_18 = arith.constant 0 : index
      %c0_19 = arith.constant 0 : index
      %28 = vector.load %arg7[%c0_18, %c0_19] : memref<1x128xf32, #tpu.memory_space<vmem>>, vector<1x128xf32>
      tpu.vector_store %arg7[%c0_18, %c0_19], %27 {strides = array<i32>} : memref<1x128xf32, #tpu.memory_space<vmem>>, vector<1x128xf32>,
    } else {
    }
    return
  }
  func.func @transform_0(%arg0: i32, %arg1: i32) -> (i32, i32) {
    %c0_i32 = arith.constant 0 : i32
    %c0_i32_0 = arith.constant 0 : i32
    return %arg1, %c0_i32 : i32, i32
  }
  func.func @transform_1(%arg0: i32, %arg1: i32) -> (i32, i32) {
    %c0_i32 = arith.constant 0 : i32
    %c0_i32_0 = arith.constant 0 : i32
    return %c0_i32, %arg0 : i32, i32
  }
  func.func @transform_2(%arg0: i32, %arg1: i32) -> (i32, i32) {
    %c0_i32 = arith.constant 0 : i32
    %c0_i32_0 = arith.constant 0 : i32
    return %c0_i32, %arg0 : i32, i32
  }
  func.func @transform_3(%arg0: i32, %arg1: i32) -> (i32, i32) {
    %c0_i32 = arith.constant 0 : i32
    %c0_i32_0 = arith.constant 0 : i32
    return %arg1, %c0_i32 : i32, i32
  }
  func.func @transform_4(%arg0: i32, %arg1: i32) -> (i32, i32) {
    %c0_i32 = arith.constant 0 : i32
    %c0_i32_0 = arith.constant 0 : i32
    return %c0_i32, %arg0 : i32, i32
  }
  func.func @transform_5(%arg0: i32, %arg1: i32) -> (i32, i32) {
    %c0_i32 = arith.constant 0 : i32
    %c0_i32_0 = arith.constant 0 : i32
    return %c0_i32, %arg0 : i32, i32
  }
}

</mosaic_0001>

<bundles_post_ra>
// kernel: tpu_custom_call.1
= control target key start
LH: loop header
LB: loop body
LE: loop exit
PB: predicated region body
PF: predicated region fallthrough
CT: control target
= control target key end

     0   :  { %11 = vsyncpa [#allocation5], 0  ;;  %v965_v2 = vmov 0   ;;  %s1063_s0 = inlined_call_operand.vmem [shape: bf16[128,128], index: 0, kind: input, shape index: {}]   ;;  %s1064_s1 = inlined_call_operand.vmem [shape: bf16[128,128], index: 1, kind: input, shape index: {}]   ;;  %s1065_s2 = inlined_call_operand.vmem [shape: s32[1,128], index: 2, kind: input, shape index: {}]   ;;  %s1066_s3 = inlined_call_operand.vmem [shape: s32[128,1], index: 3, kind: input, shape index: {}]   ;;  %s1067_s4 = inlined_call_operand.hbm [shape: f32[1,128], index: 4, kind: output, shape index: {0}]   ;;  %s1068_s5 = inlined_call_operand.hbm [shape: f32[1,128], index: 5, kind: output, shape index: {1}]  }
   0x1   :  { %v871_v0 = vld [vmem:[%s1064_s1 + $0x38] sm:$0xff]  ;;  %v870_v1 = vld [vmem:[%s1064_s1 + $0x30] sm:$0xff]  ;;  %901 = vset.pattern.permute.xlu0 %v965_v2  ;;  %v221_v3 = vld [vmem:[%s1066_s3] sm:$0xff] }
   0x2   :  { %156 = vmatpush.bf16.msra.mxu0 %v871_v0  ;;  %873 = vmatpush.bf16.msra.mxu2 %v871_v0 }
   0x3   :  { %874 = vmatpush.bf16.msra.mxu3 %v871_v0  ;;  %239 = vperm.xlu0 %901, %v221_v3  }
   0x4   :  { %872 = vmatpush.bf16.msra.mxu1 %v871_v0 }
   0x5   :  { %12 = vsyncpa [#allocation7], 0  ;;  %v869_v4 = vld [vmem:[%s1064_s1 + $0x28] sm:$0xff]  ;;  %v868_v6 = vld [vmem:[%s1064_s1 + $0x20] sm:$0xff]  ;;  %v966_v19 = vmov -inf   ;;  %v967_v20 = vmov 0.0   ;;  %v308_v22 = vlaneseq }
   0x6   :  { %157 = vmatpush.bf16.msra.mxu0 %v870_v1  ;;  %876 = vmatpush.bf16.msra.mxu2 %v870_v1  ;;  %v222_v5 = vld [vmem:[%s1066_s3 + $0x8] sm:$0xff]  ;;  %v867_v7 = vld [vmem:[%s1064_s1 + $0x18] sm:$0xff]  ;;  %v866_v8 = vld [vmem:[%s1064_s1 + $0x10] sm:$0xff]  ;;  %25 = vst [vmem:[#allocation2] sm:$0x1] %v966_v19  ;;  %s767_s6 = sshll.u32 %s1067_s4, 4  ;;  %s768_s6 = int_to_ptr.hbm [resolvable:$true] %s767_s6 }
   0x7   :  { %877 = vmatpush.bf16.msra.mxu3 %v870_v1  ;;  %v865_v9 = vld [vmem:[%s1064_s1 + $0x8] sm:$0xff]  ;;  %v864_v10 = vld [vmem:[%s1064_s1] sm:$0xff]  ;;  %v862_v13 = vld [vmem:[%s1063_s0 + $0x30] sm:$0xff]  ;;  %26 = vst [vmem:[#allocation3] sm:$0x1] %v967_v20  ;;  %v309_v23 = vshrl.u32 %v308_v22, 7 }
   0x8   :  { %875 = vmatpush.bf16.msra.mxu1 %v870_v1  ;;  %v856_v11 = vld [vmem:[%s1063_s0] sm:$0xff]  ;;  %v858_v14 = vld [vmem:[%s1063_s0 + $0x10] sm:$0xff]  ;;  %v857_v15 = vld [vmem:[%s1063_s0 + $0x8] sm:$0xff]  ;;  %27 = vst [vmem:[#allocation4] sm:$0x1] %v967_v20  ;;  %v344_v25 = vand.u32 127, %v308_v22 }
   0x9   :  { %v860_v12 = vld [vmem:[%s1063_s0 + $0x20] sm:$0xff]  ;;  %v861_v16 = vld [vmem:[%s1063_s0 + $0x28] sm:$0xff]  ;;  %v863_v17 = vld [vmem:[%s1063_s0 + $0x38] sm:$0xff]  ;;  %v310_v27 = vadd.s32 8, %v309_v23  ;;  %s969_s4 = smov [#allocation6]   ;;  %s778_s9 = sshll.u32 %s1068_s5, 4  ;;  %s779_s9 = int_to_ptr.hbm [resolvable:$true] %s778_s9 }
   0xa   :  { %158 = vmatpush.bf16.msra.mxu0 %v869_v4  ;;  %879 = vmatpush.bf16.msra.mxu2 %v869_v4  ;;  %v859_v18 = vld [vmem:[%s1063_s0 + $0x18] sm:$0xff]  ;;  %v902_v24 = vld [vmem:[%s1065_s2] ss:$0 sm:$0xff]  ;;  %vm348_vm0 = vcmp.ne.s32.totalorder %v309_v23, %v344_v25  ;;  %s968_s0 = smov [#allocation4]   ;;  %s776_s7 = sshll.u32 %s969_s4, 4  ;;  %s777_s7 = int_to_ptr.vmem [resolvable:$true] %s776_s7 }
   0xb   :  { %880 = vmatpush.bf16.msra.mxu3 %v869_v4  ;;  %242 = vperm.xlu0 %901, %v222_v5   ;;  %vm349_vm2 = vcmp.ne.s32.totalorder %v310_v27, %v344_v25  ;;  %s765_s2 = sshll.u32 %s968_s0, 4  ;;  %s766_s2 = int_to_ptr.vmem [resolvable:$true] %s765_s2 }
   0xc   :  { %878 = vmatpush.bf16.msra.mxu1 %v869_v4 }
   0xd   :  { %v481_v56 = vld [vmem:[#allocation2] sm:$0x1] }
   0xe   :  { %159 = vmatpush.bf16.msra.mxu0 %v868_v6  ;;  %882 = vmatpush.bf16.msra.mxu2 %v868_v6 }
   0xf   :  { %883 = vmatpush.bf16.msra.mxu3 %v868_v6  ;;  %v564_v59 = vld [vmem:[#allocation4] sm:$0x1] }
  0x10   :  { %881 = vmatpush.bf16.msra.mxu1 %v868_v6 }
  0x12   :  { %160 = vmatpush.bf16.msra.mxu0 %v867_v7  ;;  %885 = vmatpush.bf16.msra.mxu2 %v867_v7 }
  0x13   :  { %886 = vmatpush.bf16.msra.mxu3 %v867_v7 }
  0x14   :  { %884 = vmatpush.bf16.msra.mxu1 %v867_v7 }
  0x16   :  { %161 = vmatpush.bf16.msra.mxu0 %v866_v8  ;;  %888 = vmatpush.bf16.msra.mxu2 %v866_v8 }
  0x17   :  { %889 = vmatpush.bf16.msra.mxu3 %v866_v8 }
  0x18   :  { %887 = vmatpush.bf16.msra.mxu1 %v866_v8 }
  0x1a   :  { %162 = vmatpush.bf16.msra.mxu0 %v865_v9  ;;  %891 = vmatpush.bf16.msra.mxu2 %v865_v9 }
  0x1b   :  { %892 = vmatpush.bf16.msra.mxu3 %v865_v9 }
  0x1c   :  { %890 = vmatpush.bf16.msra.mxu1 %v865_v9 }
  0x1e   :  { %163 = vmatpush.bf16.msra.mxu0 %v864_v10  ;;  %894 = vmatpush.bf16.msra.mxu2 %v864_v10 }
  0x1f   :  { %895 = vmatpush.bf16.msra.mxu3 %v864_v10 }
  0x20   :  { %893 = vmatpush.bf16.msra.mxu1 %v864_v10 }
  0x21   :  { %164 = vmatmul.bf16.vlgmr.msra.gmra.mxu0 %v856_v11  ;;  %184 = vmatmul.bf16.vlgmr.msra.gmra.mxu2 %v860_v12 }
  0x22   :  { %194 = vmatmul.bf16.vlgmr.msra.gmra.mxu3 %v862_v13 }
  0x23   :  { %174 = vmatmul.bf16.vlgmr.msra.gmra.mxu1 %v858_v14 }
  0x31   :  { %169 = vmatmul.bf16.gmra.mxu0 %v857_v15  ;;  %189 = vmatmul.bf16.gmra.mxu2 %v861_v16 }
  0x32   :  { %199 = vmatmul.bf16.gmra.mxu3 %v863_v17 }
  0x33   :  { %179 = vmatmul.bf16.gmra.mxu1 %v859_v18 }
  0x75   :  { %v240_v21 = vpop.permute.xlu0 %239 }
  0x76   :  { %vm287_vm1 = vcmp.eq.s32.totalorder %v240_v21, %v902_v24 }
  0x77   :  { %vm444_vm4 = vmand %vm287_vm1, %vm348_vm0 }
  0x7d   :  { %v243_v28 = vpop.permute.xlu0 %242 }
  0x7e   :  { %vm288_vm3 = vcmp.eq.s32.totalorder %v243_v28, %v902_v24 }
  0x7f   :  { %vm445_vm5 = vmand %vm288_vm3, %vm349_vm2 }
  0x9e   :  { %v165_v26 = vpop.f32.mrf.mxu0 }
  0x9f   :  { %v205_v30 = vmul.f32 14.285714, %v165_v26 }
  0xa0   :  { %v175_v29 = vpop.f32.mrf.mxu1 }
  0xa1   :  { %v428_v36 = vsel %vm348_vm0, %v205_v30, -inf  ;;  %v565_v37 = vsel %vm444_vm4, %v205_v30, 0.0 }
  0xa4   :  { %v185_v31 = vpop.f32.mrf.mxu2 }
  0xa5   :  { %v195_v32 = vpop.f32.mrf.mxu3 }
  0xa6   :  { %v167_v33 = vpop.f32.mrf.mxu0 }
  0xa7   :  { %v206_v34 = vmul.f32 14.285714, %v167_v33 }
  0xa8   :  { %v177_v35 = vpop.f32.mrf.mxu1 }
  0xa9   :  { %v429_v38 = vsel %vm349_vm2, %v206_v34, -inf  ;;  %v566_v39 = vsel %vm445_vm5, %v206_v34, 0.0 }
  0xaa   :  { %v472_v40 = vmax.f32 %v428_v36, %v429_v38  ;;  %v581_v41 = vadd.f32 %v566_v39, %v565_v37  ;;  %v538_v37 = vld [vmem:[#allocation3] sm:$0x1] }
  0xac   :  { %v475_v42 = vrot.slane %v472_v40, 4  ;;  %v596_v43 = vrot.slane %v581_v41, 4  ;;  %v187_v44 = vpop.f32.mrf.mxu2 }
  0xad   :  { %v197_v45 = vpop.f32.mrf.mxu3 }
  0xae   :  { %v476_v46 = vmax.f32 %v472_v40, %v475_v42  ;;  %v597_v47 = vadd.f32 %v596_v43, %v581_v41  ;;  %v170_v48 = vpop.f32.mrf.mxu0 }
  0xb0   :  { %v477_v49 = vrot.slane %v476_v46, 2  ;;  %v598_v50 = vrot.slane %v597_v47, 2  ;;  %v180_v51 = vpop.f32.mrf.mxu1 }
  0xb2   :  { %v478_v52 = vmax.f32 %v476_v46, %v477_v49  ;;  %v599_v53 = vadd.f32 %v598_v50, %v597_v47 }
  0xb4   :  { %v479_v54 = vrot.slane %v478_v52, 1  ;;  %v600_v55 = vrot.slane %v599_v53, 1  ;;  %v190_v57 = vpop.f32.mrf.mxu2 }
  0xb5   :  { %v200_v58 = vpop.f32.mrf.mxu3 }
  0xb6   :  { %v480_v60 = vmax.f32 %v478_v52, %v479_v54  ;;  %v172_v61 = vpop.f32.mrf.mxu0  ;;  %v601_v62 = vadd.f32 %v600_v55, %v599_v53 }
  0xb8   :  { %v482_v63 = vmax.f32 %v481_v56, %v480_v60  ;;  %v182_v0 = vpop.f32.mrf.mxu1  ;;  %v602_v1 = vadd.f32 %v601_v62, %v564_v59 }
  0xba   :  { %v483_v2 = vmax.f32 %v482_v63, -1e+30  ;;  %603 = vst [vmem:[#allocation4] sm:$0x1] %v602_v1 }
  0xbb   :  { %770 = dma.vmem_to_hbm [thread:$0]  %s766_s2, 16, %s768_s6, [#allocation5]  }
  0xbc   :  { %v488_v3 = vperm.slane %v483_v2, 0  ;;  %563 = vst [vmem:[#allocation2] sm:$0x1] %v483_v2  ;;  %v192_v4 = vpop.f32.mrf.mxu2  ;;  %v484_v27 = vsub.f32 %v481_v56, %v483_v2 }
  0xbd   :  { %v202_v5 = vpop.f32.mrf.mxu3 }
  0xbe   :  { %v490_v6 = vsub.f32 %v428_v36, %v488_v3  ;;  %v491_v7 = vsub.f32 %v429_v38, %v488_v3  ;;  %v492_v8 = vsub.f32 -inf, %v488_v3  ;;  %v485_v30 = vmul.f32 1.442695, %v484_v27 }
  0xc0   :  { %v506_v9 = vmul.f32 1.442695, %v490_v6  ;;  %v508_v10 = vmul.f32 1.442695, %v491_v7  ;;  %v510_v11 = vmul.f32 1.442695, %v492_v8 }
  0xc2   :  { %903 = vpow2.f32 %v506_v9 }
  0xc3   :  { %905 = vpow2.f32 %v508_v10  ;;  %v754_v45 = vld [vmem:[#allocation2] sm:$0x1] }
  0xc4   :  { %907 = vpow2.f32 %v510_v11 }
  0xc5   :  { %909 = vpow2.f32 %v485_v30 }
  0xc8   :  { %v904_v12 = vpop.eup %903 }
  0xc9   :  { %v906_v13 = vpop.eup %905 }
  0xca   :  { %v540_v14 = vadd.f32 %v906_v13, %v904_v12  ;;  %v908_v15 = vpop.eup %907 }
  0xcb   :  { %v910_v36 = vpop.eup %909 }
  0xcc   :  { %v541_v16 = vadd.f32 %v908_v15, %v540_v14  ;;  %v539_v39 = vmul.f32 %v910_v36, %v538_v37 }
  0xce   :  { %v542_v17 = vadd.f32 %v908_v15, %v541_v16 }
  0xd0   :  { %v543_v18 = vadd.f32 %v908_v15, %v542_v17 }
  0xd2   :  { %v544_v19 = vadd.f32 %v908_v15, %v543_v18 }
  0xd4   :  { %v545_v20 = vadd.f32 %v908_v15, %v544_v19 }
  0xd6   :  { %v546_v21 = vadd.f32 %v908_v15, %v545_v20 }
  0xd8   :  { %v547_v22 = vadd.f32 %v908_v15, %v546_v21 }
  0xda   :  { %v548_v23 = vadd.f32 %v908_v15, %v547_v22 }
  0xdc   :  { %v549_v24 = vadd.f32 %v908_v15, %v548_v23 }
  0xde   :  { %v550_v25 = vadd.f32 %v908_v15, %v549_v24 }
  0xe0   :  { %v551_v26 = vadd.f32 %v908_v15, %v550_v25 }
  0xe2   :  { %v552_v28 = vadd.f32 %v908_v15, %v551_v26 }
  0xe4   :  { %v553_v29 = vadd.f32 %v908_v15, %v552_v28 }
  0xe6   :  { %v554_v31 = vadd.f32 %v908_v15, %v553_v29 }
  0xe8   :  { %v555_v32 = vrot.slane %v554_v31, 4 }
  0xea   :  { %v556_v33 = vadd.f32 %v555_v32, %v554_v31 }
  0xec   :  { %v557_v34 = vrot.slane %v556_v33, 2 }
  0xee   :  { %v558_v35 = vadd.f32 %v557_v34, %v556_v33 }
  0xf0   :  { %v559_v38 = vrot.slane %v558_v35, 1 }
  0xf2   :  { %v560_v40 = vadd.f32 %v559_v38, %v558_v35 }
  0xf4   :  { %v561_v41 = vadd.f32 %v560_v40, %v539_v39 }
  0xf6   :  { %562 = vst [vmem:[#allocation3] sm:$0x1] %v561_v41 }
  0xfd   :  { %v755_v42 = vld [vmem:[#allocation3] sm:$0x1] }
  0xfe   :  { %911 = vlog2.f32 %v755_v42 }
 0x104   :  { %v912_v43 = vpop.eup %911 }
 0x105   :  { %v757_v44 = vmul.f32 0.6931472, %v912_v43 }
 0x107   :  { %v758_v46 = vadd.f32 %v757_v44, %v754_v45 }
 0x109   :  { %759 = vst [vmem:[#allocation6] sm:$0x1] %v758_v46 }
 0x10a   :  { %781 = dma.vmem_to_hbm [thread:$0]  %s777_s7, 16, %s779_s9, [#allocation7]  }
 0x10b   :  { %961 = dma.done.wait [#allocation5], 16  }
 0x10c   :  { %962 = vsyncadd [#allocation5], 4294967280 }
 0x10d   :  { %963 = dma.done.wait [#allocation7], 16  }
 0x10e   :  { %964 = vsyncadd [#allocation7], 4294967280 }
 0x10f   :  { %790 = vsyncpa [#allocation5], 1 }
 0x110   :  { %791 = vsyncpa [#allocation7], 1 }

</bundles_post_ra>
